<compile_context>
chip_gen: v7x
topology: tpu7x:2x2x1
jax: 0.10.0
libtpu: 0.0.40
codegen_flags: <defaults>
</compile_context>

<pallas_src>
import functools
import math

import jax
import jax.numpy as jnp
from jax import lax
from jax.experimental import pallas as pl
from jax.experimental.pallas import tpu as pltpu


# q @ k^T via dot_general contracting the d_kv axes directly (no explicit .T).
_TRANS_B_DIMS = (((1,), (1,)), ((), ()))


# ------------------------- Pallas kernel -------------------------

def _t5_attn_kernel(hid_ref, wqkv_ref, wo_ref, bias_ref, out_ref, ctx_ref,
                    *, HB, dkv):
    """One (batch b, head-block hb) grid step.

    hid_ref : (1, S, D)            bf16 hidden states for batch b
    wqkv_ref: (n_hb, D, 3*HB*dkv)  bf16 fused [Wq|Wk|Wv], VMEM-resident
    wo_ref  : (n_hb, HB*dkv, D)    bf16 output projection block, VMEM-resident
    bias_ref: (HB, S, S)           f32 relative position bias for this head blk
    out_ref : (1, S, D)            f32 output block for batch b; also the
                                   accumulator over head blocks (same block
                                   index for every hb)
    ctx_ref : (S, HB*dkv)          bf16 scratch for per-head attn @ V outputs
    """
    hb = pl.program_id(1)

    @pl.when(hb == 0)
    def _():
        out_ref[...] = jnp.zeros_like(out_ref)

    x = hid_ref[0]                                   # (S, D) bf16
    n = HB * dkv

    # Fused q/k/v projection for the whole head block: one wide MXU matmul.
    qkv = jnp.dot(x, wqkv_ref[hb],
                  preferred_element_type=jnp.float32)  # (S, 3*HB*dkv) f32
    qkv = qkv.astype(jnp.bfloat16)

    for h in range(HB):                              # static unroll over heads
        qh = qkv[:, h * dkv:(h + 1) * dkv]
        kh = qkv[:, n + h * dkv:n + (h + 1) * dkv]
        vh = qkv[:, 2 * n + h * dkv:2 * n + (h + 1) * dkv]

        # scores = q @ k^T  (NOTE: T5 does NOT scale by sqrt(d_kv))
        s = lax.dot_general(qh, kh, _TRANS_B_DIMS,
                            preferred_element_type=jnp.float32)   # (S, S) f32
        s = s + bias_ref[h]

        # numerically stable softmax, strictly in f32
        s = s - jnp.max(s, axis=-1, keepdims=True)
        e = jnp.exp(s)
        p = e * pl.reciprocal(jnp.sum(e, axis=-1, keepdims=True), approx=True)

        # TODO(synk): attention dropout is identity in eval mode; training-mode
        # dropout would use pltpu.prng_seed / pltpu.stateful_bernoulli here.
        ctx_ref[:, h * dkv:(h + 1) * dkv] = jnp.dot(
            p.astype(jnp.bfloat16), vh,
            preferred_element_type=jnp.float32).astype(jnp.bfloat16)

    # One wide output projection for the whole head block, accumulated
    # directly into the resident output block.
    out_ref[0] += jnp.dot(ctx_ref[...], wo_ref[hb],
                          preferred_element_type=jnp.float32)     # (S, D)


# ------------------------- wrapper helpers -------------------------

def _mxu_target_width():
    """Target K-width for head blocking: 256 on v6e/v7x MXUs, 128 otherwise."""
    try:
        kind = jax.devices()[0].device_kind.lower()
    except Exception:
        return 128
    if "v6" in kind or "v7" in kind or "tpu7" in kind:
        return 256
    return 128


def _vmem_limit_bytes():
    """~3/4 of physical VMEM (96 MiB on v5e/v6e, 48 MiB on v7x), capped."""
    cap = None
    try:
        cap = getattr(pltpu.get_tpu_info(), "vmem_capacity_bytes", None)
    except Exception:
        cap = None
    if not cap:
        cap = 64 * 1024 * 1024          # conservative fallback (v7x physical)
    return int(min(cap * 3 // 4, 100 * 1024 * 1024))


def _choose_head_block(n_heads, d_kv, target_width):
    """Largest divisor of n_heads with head_block*d_kv <= target MXU width."""
    hb = min(n_heads, max(1, target_width // max(1, d_kv)))
    while n_heads % hb != 0:
        hb -= 1
    return hb


def t5_attention_pallas(hidden_states, wq, wk, wv, wo, position_bias,
                        n_heads, d_kv, head_block=None):
    """hidden_states: (B,S,D) f32; wq/wk/wv: (inner,D); wo: (D,inner) (PyTorch
    Linear layout, y = x @ W.T); position_bias: (H,S,S) f32."""
    B, S, D = hidden_states.shape
    H, dkv = n_heads, d_kv
    if head_block is None:
        head_block = _choose_head_block(H, dkv, _mxu_target_width())
    HB = head_block
    n_hb = H // HB
    blk = HB * dkv

    # Pack head-blocked, fused qkv weights:  (inner,D) -> (n_hb, D, HB*dkv)
    def blockify_in(w):
        return w.T.reshape(D, n_hb, blk).transpose(1, 0, 2)

    wqkv = jnp.concatenate(
        [blockify_in(wq), blockify_in(wk), blockify_in(wv)],
        axis=-1).astype(jnp.bfloat16)                       # (n_hb, D, 3*blk)
    wo_b = wo.T.reshape(n_hb, blk, D).astype(jnp.bfloat16)  # (n_hb, blk, D)
    bias = position_bias.astype(jnp.float32)                # (H, S, S)
    x = hidden_states.astype(jnp.bfloat16)

    kernel = functools.partial(_t5_attn_kernel, HB=HB, dkv=dkv)

    out = pl.pallas_call(
        kernel,
        out_shape=jax.ShapeDtypeStruct((B, S, D), jnp.float32),
        grid_spec=pltpu.PrefetchScalarGridSpec(
            num_scalar_prefetch=0,
            grid=(B, n_hb),
            in_specs=[
                # hidden block for batch b (index unchanged across hb ->
                # fetched once per batch)
                pl.BlockSpec((1, S, D), lambda b, hb: (b, 0, 0)),
                # whole-weight residency: constant block index -> fetched once
                pl.BlockSpec(wqkv.shape, lambda b, hb: (0, 0, 0)),
                pl.BlockSpec(wo_b.shape, lambda b, hb: (0, 0, 0)),
                # bias blocked per head block: only 2*HB*S*S*4 bytes resident
                pl.BlockSpec((HB, S, S), lambda b, hb: (hb, 0, 0)),
            ],
            # same output block for every hb -> resident accumulator
            out_specs=pl.BlockSpec((1, S, D), lambda b, hb: (b, 0, 0)),
            scratch_shapes=[pltpu.VMEM((S, blk), jnp.bfloat16)],
        ),
        compiler_params=pltpu.CompilerParams(
            dimension_semantics=("parallel", "arbitrary"),
            vmem_limit_bytes=_vmem_limit_bytes(),
        ),
    )(x, wqkv, wo_b, bias)
    return out


# -------------- T5 relative position bias (plain-JAX glue) --------------

def _relative_position_bucket(relative_position, bidirectional=True,
                              num_buckets=32, max_distance=128):
    relative_buckets = jnp.zeros_like(relative_position)
    if bidirectional:
        num_buckets //= 2
        relative_buckets += (relative_position > 0).astype(jnp.int32) * num_buckets
        relative_position = jnp.abs(relative_position)
    else:
        relative_position = -jnp.minimum(relative_position,
                                         jnp.zeros_like(relative_position))
    max_exact = num_buckets // 2
    is_small = relative_position < max_exact
    rp_safe = jnp.maximum(relative_position, 1).astype(jnp.float32)
    rp_if_large = max_exact + (
        jnp.log(rp_safe / max_exact)
        / math.log(max_distance / max_exact)
        * (num_buckets - max_exact)
    ).astype(jnp.int32)
    rp_if_large = jnp.minimum(rp_if_large, num_buckets - 1)
    relative_buckets += jnp.where(is_small, relative_position, rp_if_large)
    return relative_buckets


def compute_position_bias(rel_attn_bias_weight, query_length, key_length,
                          bidirectional=True, num_buckets=32):
    """rel_attn_bias_weight: (num_buckets, n_heads) -> (n_heads, q, k)."""
    context_position = jnp.arange(query_length, dtype=jnp.int32)[:, None]
    memory_position = jnp.arange(key_length, dtype=jnp.int32)[None, :]
    relative_position = memory_position - context_position
    buckets = _relative_position_bucket(relative_position,
                                        bidirectional=bidirectional,
                                        num_buckets=num_buckets)
    values = jnp.take(rel_attn_bias_weight, buckets, axis=0)   # (q, k, H)
    return jnp.transpose(values, (2, 0, 1))                    # (H, q, k)


# ------------------------- reference (pure JAX) -------------------------

def t5_attention_ref(hidden_states, wq, wk, wv, wo, position_bias_h):
    B, S, D = hidden_states.shape
    H = position_bias_h.shape[0]
    dkv = wq.shape[0] // H
    q = (hidden_states @ wq.T).reshape(B, S, H, dkv).transpose(0, 2, 1, 3)
    k = (hidden_states @ wk.T).reshape(B, S, H, dkv).transpose(0, 2, 1, 3)
    v = (hidden_states @ wv.T).reshape(B, S, H, dkv).transpose(0, 2, 1, 3)
    scores = jnp.einsum("bhqd,bhkd->bhqk", q, k) + position_bias_h[None]
    attn = jax.nn.softmax(scores.astype(jnp.float32), axis=-1)
    ctx = jnp.einsum("bhqk,bhkd->bhqd", attn, v)
    ctx = ctx.transpose(0, 2, 1, 3).reshape(B, S, H * dkv)
    return ctx @ wo.T


# ------------------------- main -------------------------

if __name__ == "__main__":
    # Small T5 config
    B, S = 2, 8
    d_model = 32
    n_heads = 4
    d_kv = 8
    inner_dim = n_heads * d_kv
    num_buckets = 32
    is_decoder = False  # bidirectional relative attention

    key = jax.random.PRNGKey(0)
    k_hid, k_q, k_k, k_v, k_o, k_rel = jax.random.split(key, 6)

    hidden_states = jax.random.normal(k_hid, (B, S, d_model), dtype=jnp.float32)

    # PyTorch Linear weights: (out_features, in_features), y = x @ W.T (no bias)
    wq = jax.random.normal(k_q, (inner_dim, d_model), dtype=jnp.float32) * 0.05
    wk = jax.random.normal(k_k, (inner_dim, d_model), dtype=jnp.float32) * 0.05
    wv = jax.random.normal(k_v, (inner_dim, d_model), dtype=jnp.float32) * 0.05
    wo = jax.random.normal(k_o, (d_model, inner_dim), dtype=jnp.float32) * 0.05
    rel_bias_weight = jax.random.normal(k_rel, (num_buckets, n_heads),
                                        dtype=jnp.float32) * 0.1

    # Relative position bias (has_relative_attention_bias=True path)
    position_bias_h = compute_position_bias(
        rel_bias_weight, S, S, bidirectional=not is_decoder,
        num_buckets=num_buckets)                                     # (H, S, S)

    out = t5_attention_pallas(hidden_states, wq, wk, wv, wo,
                              position_bias_h, n_heads, d_kv)
    out = jax.block_until_ready(out)
    assert out.shape == (B, S, d_model)

    # Reference with bf16-rounded matmul inputs (matches kernel's bf16 MXU path;
    # softmax / accumulation stay in f32 as in the kernel).
    def _r(a):
        return a.astype(jnp.bfloat16).astype(jnp.float32)

    ref = t5_attention_ref(_r(hidden_states), _r(wq), _r(wk), _r(wv), _r(wo),
                           position_bias_h)
    err = jnp.max(jnp.abs(out - ref))
    assert jnp.allclose(out, ref, rtol=5e-2, atol=5e-3), f"max err {err}"

    print("KERNEL_OK")
</pallas_src>

<mosaic_0001>
module attributes {stable_mosaic.version = 11 : i64} {
  func.func @_t5_attn_kernel(%arg0: i32, %arg1: i32, %arg2: memref<1x8x32xbf16, #tpu.memory_space<vmem>>, %arg3: memref<1x32x96xbf16, #tpu.memory_space<vmem>>, %arg4: memref<1x32x32xbf16, #tpu.memory_space<vmem>>, %arg5: memref<4x8x8xf32, #tpu.memory_space<vmem>>, %arg6: memref<1x8x32xf32, #tpu.memory_space<vmem>>, %arg7: memref<8x32xbf16, #tpu.memory_space<vmem>>) attributes {dimension_semantics = [#tpu.dimension_semantics<parallel>, #tpu.dimension_semantics<arbitrary>], iteration_bounds = array<i64: 2, 1>, scalar_prefetch = 0 : i64, scratch_operands = 1 : i64, tpu.core_type = #tpu.core_type<tc>, window_params = [{transform_indices = @transform_0, window_bounds = array<i64: 1, 8, 32>}, {pipeline_mode = #tpu.pipeline_mode<synchronous>, transform_indices = @transform_1, window_bounds = array<i64: 1, 32, 96>}, {pipeline_mode = #tpu.pipeline_mode<synchronous>, transform_indices = @transform_2, window_bounds = array<i64: 1, 32, 32>}, {transform_indices = @transform_3, window_bounds = array<i64: 4, 8, 8>}, {transform_indices = @transform_4, window_bounds = array<i64: 1, 8, 32>}]} {
    %c0_i32 = arith.constant 0 : i32
    %0 = arith.cmpi eq, %arg1, %c0_i32 : i32
    %1 = arith.extui %0 : i1 to i32
    %c0_i32_0 = arith.constant 0 : i32
    %2 = arith.cmpi ne, %1, %c0_i32_0 : i32
    scf.if %2 {
      %cst_46 = arith.constant 0.000000e+00 : f32
      %105 = vector.broadcast %cst_46 : f32 to vector<1x8x32xf32>
      %c0_47 = arith.constant 0 : index
      %c0_48 = arith.constant 0 : index
      %c0_49 = arith.constant 0 : index
      %106 = vector.load %arg6[%c0_47, %c0_48, %c0_49] : memref<1x8x32xf32, #tpu.memory_space<vmem>>, vector<1x8x32xf32>
      tpu.vector_store %arg6[%c0_47, %c0_48, %c0_49], %105 {strides = array<i32>} : memref<1x8x32xf32, #tpu.memory_space<vmem>>, vector<1x8x32xf32>,
    } else {
    }
    %c0 = arith.constant 0 : index
    %c0_1 = arith.constant 0 : index
    %c0_2 = arith.constant 0 : index
    %3 = vector.load %arg2[%c0, %c0_1, %c0_2] : memref<1x8x32xbf16, #tpu.memory_space<vmem>>, vector<1x8x32xbf16>
    %4 = vector.shape_cast %3 : vector<1x8x32xbf16> to vector<8x32xbf16>
    %5 = arith.index_cast %arg1 : i32 to index
    %c0_3 = arith.constant 0 : index
    %c0_4 = arith.constant 0 : index
    %6 = vector.load %arg3[%5, %c0_3, %c0_4] : memref<1x32x96xbf16, #tpu.memory_space<vmem>>, vector<1x32x96xbf16>
    %7 = vector.shape_cast %6 : vector<1x32x96xbf16> to vector<32x96xbf16>
    %cst = arith.constant dense<0.000000e+00> : vector<8x96xf32>
    %8 = tpu.matmul %4, %7, %cst {dimension_numbers = #tpu.dot_dimension_numbers<[1], [0], [0], [1], [0, 0, 1, 1], [], []>} : vector<8x32xbf16>, vector<32x96xbf16>, vector<8x96xf32> -> vector<8x96xf32>
    %9 = arith.truncf %8 : vector<8x96xf32> to vector<8x96xbf16>
    %10 = vector.extract_strided_slice %9 {offsets = [0, 0], sizes = [8, 8], strides = [1, 1]} : vector<8x96xbf16> to vector<8x8xbf16>
    %11 = vector.extract_strided_slice %9 {offsets = [0, 32], sizes = [8, 8], strides = [1, 1]} : vector<8x96xbf16> to vector<8x8xbf16>
    %12 = vector.extract_strided_slice %9 {offsets = [0, 64], sizes = [8, 8], strides = [1, 1]} : vector<8x96xbf16> to vector<8x8xbf16>
    %cst_5 = arith.constant dense<0.000000e+00> : vector<8x8xf32>
    %13 = tpu.matmul %10, %11, %cst_5 {dimension_numbers = #tpu.dot_dimension_numbers<[1], [1], [0], [0], [0, 0, 1, 0], [], []>} : vector<8x8xbf16>, vector<8x8xbf16>, vector<8x8xf32> -> vector<8x8xf32>
    %c0_6 = arith.constant 0 : index
    %c0_7 = arith.constant 0 : index
    %c0_8 = arith.constant 0 : index
    %14 = vector.load %arg5[%c0_6, %c0_7, %c0_8] : memref<4x8x8xf32, #tpu.memory_space<vmem>>, vector<1x8x8xf32>
    %15 = vector.shape_cast %14 : vector<1x8x8xf32> to vector<8x8xf32>
    %16 = arith.addf %13, %15 : vector<8x8xf32>
    %cst_9 = arith.constant dense<0xFF800000> : vector<8xf32>
    %17 = vector.multi_reduction <maximumf>, %16, %cst_9 [1] : vector<8x8xf32> to vector<8xf32>
    %18 = vector.shape_cast %17 : vector<8xf32> to vector<8x1xf32>
    %19 = vector.broadcast %18 : vector<8x1xf32> to vector<8x8xf32>
    %20 = arith.subf %16, %19 : vector<8x8xf32>
    %21 = math.exp %20 : vector<8x8xf32>
    %cst_10 = arith.constant dense<0.000000e+00> : vector<8xf32>
    %22 = vector.multi_reduction <add>, %21, %cst_10 [1] : vector<8x8xf32> to vector<8xf32>
    %23 = vector.shape_cast %22 : vector<8xf32> to vector<8x1xf32>
    %24 = tpu.reciprocal %23 {approx = true} : vector<8x1xf32> -> vector<8x1xf32>
    %25 = vector.broadcast %24 : vector<8x1xf32> to vector<8x8xf32>
    %26 = arith.mulf %21, %25 : vector<8x8xf32>
    %27 = arith.truncf %26 : vector<8x8xf32> to vector<8x8xbf16>
    %cst_11 = arith.constant dense<0.000000e+00> : vector<8x8xf32>
    %28 = tpu.matmul %27, %12, %cst_11 {dimension_numbers = #tpu.dot_dimension_numbers<[1], [0], [0], [1], [0, 0, 1, 1], [], []>} : vector<8x8xbf16>, vector<8x8xbf16>, vector<8x8xf32> -> vector<8x8xf32>
    %29 = arith.truncf %28 : vector<8x8xf32> to vector<8x8xbf16>
    %c0_12 = arith.constant 0 : index
    %c0_13 = arith.constant 0 : index
    %30 = vector.load %arg7[%c0_12, %c0_13] : memref<8x32xbf16, #tpu.memory_space<vmem>>, vector<8x8xbf16>
    tpu.vector_store %arg7[%c0_12, %c0_13], %29 {strides = array<i32>} : memref<8x32xbf16, #tpu.memory_space<vmem>>, vector<8x8xbf16>,
    %31 = vector.extract_strided_slice %9 {offsets = [0, 8], sizes = [8, 8], strides = [1, 1]} : vector<8x96xbf16> to vector<8x8xbf16>
    %32 = vector.extract_strided_slice %9 {offsets = [0, 40], sizes = [8, 8], strides = [1, 1]} : vector<8x96xbf16> to vector<8x8xbf16>
    %33 = vector.extract_strided_slice %9 {offsets = [0, 72], sizes = [8, 8], strides = [1, 1]} : vector<8x96xbf16> to vector<8x8xbf16>
    %cst_14 = arith.constant dense<0.000000e+00> : vector<8x8xf32>
    %34 = tpu.matmul %31, %32, %cst_14 {dimension_numbers = #tpu.dot_dimension_numbers<[1], [1], [0], [0], [0, 0, 1, 0], [], []>} : vector<8x8xbf16>, vector<8x8xbf16>, vector<8x8xf32> -> vector<8x8xf32>
    %c1 = arith.constant 1 : index
    %c0_15 = arith.constant 0 : index
    %c0_16 = arith.constant 0 : index
    %35 = vector.load %arg5[%c1, %c0_15, %c0_16] : memref<4x8x8xf32, #tpu.memory_space<vmem>>, vector<1x8x8xf32>
    %36 = vector.shape_cast %35 : vector<1x8x8xf32> to vector<8x8xf32>
    %37 = arith.addf %34, %36 : vector<8x8xf32>
    %cst_17 = arith.constant dense<0xFF800000> : vector<8xf32>
    %38 = vector.multi_reduction <maximumf>, %37, %cst_17 [1] : vector<8x8xf32> to vector<8xf32>
    %39 = vector.shape_cast %38 : vector<8xf32> to vector<8x1xf32>
    %40 = vector.broadcast %39 : vector<8x1xf32> to vector<8x8xf32>
    %41 = arith.subf %37, %40 : vector<8x8xf32>
    %42 = math.exp %41 : vector<8x8xf32>
    %cst_18 = arith.constant dense<0.000000e+00> : vector<8xf32>
    %43 = vector.multi_reduction <add>, %42, %cst_18 [1] : vector<8x8xf32> to vector<8xf32>
    %44 = vector.shape_cast %43 : vector<8xf32> to vector<8x1xf32>
    %45 = tpu.reciprocal %44 {approx = true} : vector<8x1xf32> -> vector<8x1xf32>
    %46 = vector.broadcast %45 : vector<8x1xf32> to vector<8x8xf32>
    %47 = arith.mulf %42, %46 : vector<8x8xf32>
    %48 = arith.truncf %47 : vector<8x8xf32> to vector<8x8xbf16>
    %cst_19 = arith.constant dense<0.000000e+00> : vector<8x8xf32>
    %49 = tpu.matmul %48, %33, %cst_19 {dimension_numbers = #tpu.dot_dimension_numbers<[1], [0], [0], [1], [0, 0, 1, 1], [], []>} : vector<8x8xbf16>, vector<8x8xbf16>, vector<8x8xf32> -> vector<8x8xf32>
    %50 = arith.truncf %49 : vector<8x8xf32> to vector<8x8xbf16>
    %c0_20 = arith.constant 0 : index
    %c8 = arith.constant 8 : index
    %51 = vector.load %arg7[%c0_20, %c8] : memref<8x32xbf16, #tpu.memory_space<vmem>>, vector<8x8xbf16>
    tpu.vector_store %arg7[%c0_20, %c8], %50 {strides = array<i32>} : memref<8x32xbf16, #tpu.memory_space<vmem>>, vector<8x8xbf16>,
    %52 = vector.extract_strided_slice %9 {offsets = [0, 16], sizes = [8, 8], strides = [1, 1]} : vector<8x96xbf16> to vector<8x8xbf16>
    %53 = vector.extract_strided_slice %9 {offsets = [0, 48], sizes = [8, 8], strides = [1, 1]} : vector<8x96xbf16> to vector<8x8xbf16>
    %54 = vector.extract_strided_slice %9 {offsets = [0, 80], sizes = [8, 8], strides = [1, 1]} : vector<8x96xbf16> to vector<8x8xbf16>
    %cst_21 = arith.constant dense<0.000000e+00> : vector<8x8xf32>
    %55 = tpu.matmul %52, %53, %cst_21 {dimension_numbers = #tpu.dot_dimension_numbers<[1], [1], [0], [0], [0, 0, 1, 0], [], []>} : vector<8x8xbf16>, vector<8x8xbf16>, vector<8x8xf32> -> vector<8x8xf32>
    %c2 = arith.constant 2 : index
    %c0_22 = arith.constant 0 : index
    %c0_23 = arith.constant 0 : index
    %56 = vector.load %arg5[%c2, %c0_22, %c0_23] : memref<4x8x8xf32, #tpu.memory_space<vmem>>, vector<1x8x8xf32>
    %57 = vector.shape_cast %56 : vector<1x8x8xf32> to vector<8x8xf32>
    %58 = arith.addf %55, %57 : vector<8x8xf32>
    %cst_24 = arith.constant dense<0xFF800000> : vector<8xf32>
    %59 = vector.multi_reduction <maximumf>, %58, %cst_24 [1] : vector<8x8xf32> to vector<8xf32>
    %60 = vector.shape_cast %59 : vector<8xf32> to vector<8x1xf32>
    %61 = vector.broadcast %60 : vector<8x1xf32> to vector<8x8xf32>
    %62 = arith.subf %58, %61 : vector<8x8xf32>
    %63 = math.exp %62 : vector<8x8xf32>
    %cst_25 = arith.constant dense<0.000000e+00> : vector<8xf32>
    %64 = vector.multi_reduction <add>, %63, %cst_25 [1] : vector<8x8xf32> to vector<8xf32>
    %65 = vector.shape_cast %64 : vector<8xf32> to vector<8x1xf32>
    %66 = tpu.reciprocal %65 {approx = true} : vector<8x1xf32> -> vector<8x1xf32>
    %67 = vector.broadcast %66 : vector<8x1xf32> to vector<8x8xf32>
    %68 = arith.mulf %63, %67 : vector<8x8xf32>
    %69 = arith.truncf %68 : vector<8x8xf32> to vector<8x8xbf16>
    %cst_26 = arith.constant dense<0.000000e+00> : vector<8x8xf32>
    %70 = tpu.matmul %69, %54, %cst_26 {dimension_numbers = #tpu.dot_dimension_numbers<[1], [0], [0], [1], [0, 0, 1, 1], [], []>} : vector<8x8xbf16>, vector<8x8xbf16>, vector<8x8xf32> -> vector<8x8xf32>
    %71 = arith.truncf %70 : vector<8x8xf32> to vector<8x8xbf16>
    %c0_27 = arith.constant 0 : index
    %c16 = arith.constant 16 : index
    %72 = vector.load %arg7[%c0_27, %c16] : memref<8x32xbf16, #tpu.memory_space<vmem>>, vector<8x8xbf16>
    tpu.vector_store %arg7[%c0_27, %c16], %71 {strides = array<i32>} : memref<8x32xbf16, #tpu.memory_space<vmem>>, vector<8x8xbf16>,
    %73 = vector.extract_strided_slice %9 {offsets = [0, 24], sizes = [8, 8], strides = [1, 1]} : vector<8x96xbf16> to vector<8x8xbf16>
    %74 = vector.extract_strided_slice %9 {offsets = [0, 56], sizes = [8, 8], strides = [1, 1]} : vector<8x96xbf16> to vector<8x8xbf16>
    %75 = vector.extract_strided_slice %9 {offsets = [0, 88], sizes = [8, 8], strides = [1, 1]} : vector<8x96xbf16> to vector<8x8xbf16>
    %cst_28 = arith.constant dense<0.000000e+00> : vector<8x8xf32>
    %76 = tpu.matmul %73, %74, %cst_28 {dimension_numbers = #tpu.dot_dimension_numbers<[1], [1], [0], [0], [0, 0, 1, 0], [], []>} : vector<8x8xbf16>, vector<8x8xbf16>, vector<8x8xf32> -> vector<8x8xf32>
    %c3 = arith.constant 3 : index
    %c0_29 = arith.constant 0 : index
    %c0_30 = arith.constant 0 : index
    %77 = vector.load %arg5[%c3, %c0_29, %c0_30] : memref<4x8x8xf32, #tpu.memory_space<vmem>>, vector<1x8x8xf32>
    %78 = vector.shape_cast %77 : vector<1x8x8xf32> to vector<8x8xf32>
    %79 = arith.addf %76, %78 : vector<8x8xf32>
    %cst_31 = arith.constant dense<0xFF800000> : vector<8xf32>
    %80 = vector.multi_reduction <maximumf>, %79, %cst_31 [1] : vector<8x8xf32> to vector<8xf32>
    %81 = vector.shape_cast %80 : vector<8xf32> to vector<8x1xf32>
    %82 = vector.broadcast %81 : vector<8x1xf32> to vector<8x8xf32>
    %83 = arith.subf %79, %82 : vector<8x8xf32>
    %84 = math.exp %83 : vector<8x8xf32>
    %cst_32 = arith.constant dense<0.000000e+00> : vector<8xf32>
    %85 = vector.multi_reduction <add>, %84, %cst_32 [1] : vector<8x8xf32> to vector<8xf32>
    %86 = vector.shape_cast %85 : vector<8xf32> to vector<8x1xf32>
    %87 = tpu.reciprocal %86 {approx = true} : vector<8x1xf32> -> vector<8x1xf32>
    %88 = vector.broadcast %87 : vector<8x1xf32> to vector<8x8xf32>
    %89 = arith.mulf %84, %88 : vector<8x8xf32>
    %90 = arith.truncf %89 : vector<8x8xf32> to vector<8x8xbf16>
    %cst_33 = arith.constant dense<0.000000e+00> : vector<8x8xf32>
    %91 = tpu.matmul %90, %75, %cst_33 {dimension_numbers = #tpu.dot_dimension_numbers<[1], [0], [0], [1], [0, 0, 1, 1], [], []>} : vector<8x8xbf16>, vector<8x8xbf16>, vector<8x8xf32> -> vector<8x8xf32>
    %92 = arith.truncf %91 : vector<8x8xf32> to vector<8x8xbf16>
    %c0_34 = arith.constant 0 : index
    %c24 = arith.constant 24 : index
    %93 = vector.load %arg7[%c0_34, %c24] : memref<8x32xbf16, #tpu.memory_space<vmem>>, vector<8x8xbf16>
    tpu.vector_store %arg7[%c0_34, %c24], %92 {strides = array<i32>} : memref<8x32xbf16, #tpu.memory_space<vmem>>, vector<8x8xbf16>,
    %c0_35 = arith.constant 0 : index
    %c0_36 = arith.constant 0 : index
    %c0_37 = arith.constant 0 : index
    %94 = vector.load %arg6[%c0_35, %c0_36, %c0_37] : memref<1x8x32xf32, #tpu.memory_space<vmem>>, vector<1x8x32xf32>
    %95 = vector.shape_cast %94 : vector<1x8x32xf32> to vector<8x32xf32>
    %c0_38 = arith.constant 0 : index
    %c0_39 = arith.constant 0 : index
    %96 = vector.load %arg7[%c0_38, %c0_39] : memref<8x32xbf16, #tpu.memory_space<vmem>>, vector<8x32xbf16>
    %97 = arith.index_cast %arg1 : i32 to index
    %c0_40 = arith.constant 0 : index
    %c0_41 = arith.constant 0 : index
    %98 = vector.load %arg4[%97, %c0_40, %c0_41] : memref<1x32x32xbf16, #tpu.memory_space<vmem>>, vector<1x32x32xbf16>
    %99 = vector.shape_cast %98 : vector<1x32x32xbf16> to vector<32x32xbf16>
    %cst_42 = arith.constant dense<0.000000e+00> : vector<8x32xf32>
    %100 = tpu.matmul %96, %99, %cst_42 {dimension_numbers = #tpu.dot_dimension_numbers<[1], [0], [0], [1], [0, 0, 1, 1], [], []>} : vector<8x32xbf16>, vector<32x32xbf16>, vector<8x32xf32> -> vector<8x32xf32>
    %101 = arith.addf %95, %100 : vector<8x32xf32>
    %c0_43 = arith.constant 0 : index
    %c0_44 = arith.constant 0 : index
    %c0_45 = arith.constant 0 : index
    %102 = vector.load %arg6[%c0_43, %c0_44, %c0_45] : memref<1x8x32xf32, #tpu.memory_space<vmem>>, vector<1x8x32xf32>
    %103 = vector.shape_cast %102 : vector<1x8x32xf32> to vector<8x32xf32>
    %104 = vector.shape_cast %101 : vector<8x32xf32> to vector<1x8x32xf32>
    tpu.vector_store %arg6[%c0_43, %c0_44, %c0_45], %104 {strides = array<i32>} : memref<1x8x32xf32, #tpu.memory_space<vmem>>, vector<1x8x32xf32>,
    return
  }
  func.func @transform_0(%arg0: i32, %arg1: i32) -> (i32, i32, i32) {
    %c0_i32 = arith.constant 0 : i32
    %c0_i32_0 = arith.constant 0 : i32
    %c0_i32_1 = arith.constant 0 : i32
    return %arg0, %c0_i32, %c0_i32_0 : i32, i32, i32
  }
  func.func @transform_1(%arg0: i32, %arg1: i32) -> (i32, i32, i32) {
    %c0_i32 = arith.constant 0 : i32
    %c0_i32_0 = arith.constant 0 : i32
    %c0_i32_1 = arith.constant 0 : i32
    %c0_i32_2 = arith.constant 0 : i32
    return %c0_i32, %c0_i32_0, %c0_i32_1 : i32, i32, i32
  }
  func.func @transform_2(%arg0: i32, %arg1: i32) -> (i32, i32, i32) {
    %c0_i32 = arith.constant 0 : i32
    %c0_i32_0 = arith.constant 0 : i32
    %c0_i32_1 = arith.constant 0 : i32
    %c0_i32_2 = arith.constant 0 : i32
    return %c0_i32, %c0_i32_0, %c0_i32_1 : i32, i32, i32
  }
  func.func @transform_3(%arg0: i32, %arg1: i32) -> (i32, i32, i32) {
    %c0_i32 = arith.constant 0 : i32
    %c0_i32_0 = arith.constant 0 : i32
    %c0_i32_1 = arith.constant 0 : i32
    return %arg1, %c0_i32, %c0_i32_0 : i32, i32, i32
  }
  func.func @transform_4(%arg0: i32, %arg1: i32) -> (i32, i32, i32) {
    %c0_i32 = arith.constant 0 : i32
    %c0_i32_0 = arith.constant 0 : i32
    %c0_i32_1 = arith.constant 0 : i32
    return %arg0, %c0_i32, %c0_i32_0 : i32, i32, i32
  }
}

</mosaic_0001>

<bundles_post_ra>
// kernel: tpu_custom_call.1
= control target key start
LH: loop header
LB: loop body
LE: loop exit
PB: predicated region body
PF: predicated region fallthrough
CT: control target
= control target key end

     0   :  { %9 = vsyncpa [#allocation4], 0  ;;  %s1885_s0 = inlined_call_operand.hbm [shape: bf16[2,8,32], index: 0, kind: input, shape index: {}]   ;;  %s1886_s1 = inlined_call_operand.hbm [shape: bf16[1,32,96], index: 1, kind: input, shape index: {}]   ;;  %s1887_s2 = inlined_call_operand.hbm [shape: bf16[1,32,32], index: 2, kind: input, shape index: {}]   ;;  %s1888_s3 = inlined_call_operand.hbm [shape: f32[4,8,8], index: 3, kind: input, shape index: {}]   ;;  %s1889_s4 = inlined_call_operand.hbm [shape: f32[2,8,32], index: 4, kind: output, shape index: {}]  }
   0x1   :  { %11 = vsyncpa [#allocation4 + $0x1], 0 }
   0x2   :  { %12 = vsyncpa [#allocation7], 0 }
   0x3   :  { %13 = vsyncpa [#allocation10], 0 }
   0x4   :  { %14 = vsyncpa [#allocation5], 0 }
   0x5   :  { %16 = vsyncpa [#allocation5 + $0x1], 0  ;;  %s1534_s15 = smov 0   ;;  %s1536_s16 = smov 0  }
   0x6   :  { %s1538_s17 = smov 0   ;;  %s1540_s18 = smov 0  }
   0x7   :  { %s1542_s19 = smov 0   ;;  %s1544_s20 = smov 0  }
   0x8 LB: > { %s1020_s21 = sadd.s32 4294967295, %s1482_s20   ;;  %s1021_s22 = sadd.s32 4294967294, %s1482_s20   ;;  %s1482_s20 = sphi %s1544_s20, %s22_s20   ;;  %s1478_s19 = sphi %s1542_s19, %s1916_s19   ;;  %s1474_s18 = sphi %s1540_s18, %s1915_s18   ;;  %s1470_s17 = sphi %s1538_s17, %s1914_s17   ;;  %s1466_s16 = sphi %s1536_s16, %s1913_s16   ;;  %s1462_s15 = sphi %s1534_s15, %s1912_s15  }
   0x9   : > { %p54_p0 = scmp.ne.s32.totalorder %s1466_s16, %s1462_s15  ;;  %p1568_p1 = scmp.eq.s32.totalorder %s1020_s21, 0 }
   0xa   : > { %p1572_p2 = scmp.eq.s32.totalorder %s1020_s21, 1  ;;  %p152_p3 = scmp.eq.s32.totalorder %s1021_s22, 1 }
   0xb   : > { %s1895_s23 = scalar_select %p1568_p1, 1, 0 }
   0xc   : > { %s1896_s24 = scalar_select %p1572_p2, 1, 0 }
   0xd   : > { %p1578_p4 = por %p1568_p1, %p54_p0  ;;  %p1022_p5 = scmp.ge.s32.totalorder %s1482_s20, 1 }
   0xe   : > { %p1583_p6 = por %p152_p3, %p54_p0  ;;  %p159_p7 = scmp.lt.s32.totalorder %s1482_s20, 3 }
   0xf   : > { %s1897_s25 = scalar_select %p1578_p4, 1, 0 }
  0x10   : > { %s1898_s26 = scalar_select %p1583_p6, 1, 0 }
  0x11   : > { %p1588_p8 = pnand %p1022_p5, %p159_p7  ;;  %s1484_s28 = smov [#allocation6]  }
  0x12   : > { %1899 = sst [smem:[#allocation16_spill]] %s1898_s26  ;;  %s171_s29 = sshll.u32 %s1484_s28, 4  ;;  %s1592_s29 = int_to_ptr.vmem [resolvable:$true] %s171_s29 }
  0x13   : > { %s1900_s27 = scalar_select %p1588_p8, 1, 0 }
  0x14   : > { %p1161_p9 = pneg %p1588_p8  ;;  %s1485_s5 = smov [#allocation8]  }
  0x15   : > { %s184_s6 = sshll.u32 %s1485_s5, 4  ;;  %s1486_s7 = smov [#allocation9]   ;;  %s1603_s6 = int_to_ptr.vmem [resolvable:$true] %s184_s6 }
  0x16   : > { %p1599_p11 = pnand %p1161_p9, %p1568_p1  ;;  %s1605_s8 = sshll.u32 %s1486_s7, 4  ;;  %s201_s8 = int_to_ptr.vmem [resolvable:$true] %s1605_s8 }
  0x17   : > { %s1278_s11 = scalar_lea.hbm %s1886_s1, 256 }
  0x18   : > { %p1279_p12 = scmp.ne.s32.totalorder %s1886_s1, %s1278_s11  ;;  %p1615_p13 = pneg %p1599_p11 }
  0x19   : > { %p1285_p5 = scmp.lt.u32.totalorder %s1278_s11, %s1886_s1 }
  0x1a   : > { %p1281_p0 = pnand %p1615_p13, %p1279_p12 }
  0x1c   : > { %p1282_p3 = pneg %p1281_p0 }
  0x1e   : > { %p1287_p7 = pnand %p1285_p5, %p1282_p3 }
  0x20   : > { %1290 = shalt.err (!%p1287_p7)
}
  0x21   : > { %s1291_s28 = scalar_lea.vmem %s1592_s29, 256  ;;  %p1299_p1 = scmp.lt.s32.totalorder %s1592_s29, %s1592_s29 }
  0x22   : > { %p1292_p9 = scmp.ne.s32.totalorder %s1592_s29, %s1291_s28  ;;  %p1300_p4 = scmp.lt.s32.totalorder %s1291_s28, %s1291_s28 }
  0x24   : > { %p1294_p10 = pnand %p1292_p9, %p1615_p13  ;;  %p1301_p12 = por %p1300_p4, %p1299_p1 }
  0x26   : > { %p1295_p6 = pneg %p1294_p10 }
  0x28   : > { %p1302_p0 = pnand %p1301_p12, %p1295_p6 }
  0x2a   : > { %1305 = shalt.err (!%p1302_p0)
}
  0x2b   : > { %s1487_s5 = smov 64   ;;  %s1488_s7 = smov 4  }
  0x2c   : > { %1164 = dma.hbm_to_vmem [thread:$0]  (!%p1599_p11), %s1886_s1, 256, %s1592_s29, [#allocation7], %s1487_s5, %s1487_s5, %s1488_s7  }
  0x2d   : > { %s1306_s13 = scalar_lea.hbm %s1887_s2, 256 }
  0x2e   : > { %p1307_p1 = scmp.ne.s32.totalorder %s1887_s2, %s1306_s13  ;;  %p1313_p10 = scmp.lt.u32.totalorder %s1306_s13, %s1887_s2 }
  0x30   : > { %p1309_p4 = pnand %p1307_p1, %p1615_p13 }
  0x32   : > { %p1310_p6 = pneg %p1309_p4 }
  0x34   : > { %p1315_p3 = pnand %p1313_p10, %p1310_p6 }
  0x36   : > { %1318 = shalt.err (!%p1315_p3)
}
  0x37   : > { %s1319_s29 = scalar_lea.vmem %s1603_s6, 256  ;;  %p1327_p12 = scmp.lt.s32.totalorder %s1603_s6, %s1603_s6 }
  0x38   : > { %p1320_p5 = scmp.ne.s32.totalorder %s1603_s6, %s1319_s29  ;;  %p1328_p0 = scmp.lt.s32.totalorder %s1319_s29, %s1319_s29 }
  0x3a   : > { %p1322_p7 = pnand %p1320_p5, %p1615_p13  ;;  %p1329_p1 = por %p1328_p0, %p1327_p12 }
  0x3c   : > { %p1323_p9 = pneg %p1322_p7 }
  0x3e   : > { %p1330_p4 = pnand %p1329_p1, %p1323_p9 }
  0x40   : > { %1333 = shalt.err (!%p1330_p4)
}
  0x41   : > { %1167 = dma.hbm_to_vmem [thread:$0]  (!%p1599_p11), %s1887_s2, 256, %s1603_s6, [#allocation7], %s1487_s5, %s1487_s5, %s1488_s7  }
  0x42   : > { %s1334_s12 = scalar_lea.hbm %s1888_s3, 512 }
  0x43   : > { %p1335_p6 = scmp.ne.s32.totalorder %s1888_s3, %s1334_s12  ;;  %p1341_p5 = scmp.lt.u32.totalorder %s1334_s12, %s1888_s3 }
  0x45   : > { %p1337_p10 = pnand %p1335_p6, %p1615_p13 }
  0x47   : > { %p1338_p3 = pneg %p1337_p10 }
  0x49   : > { %p1343_p7 = pnand %p1341_p5, %p1338_p3 }
  0x4b   : > { %1346 = shalt.err (!%p1343_p7)
}
  0x4c   : > { %s1347_s29 = scalar_lea.vmem %s201_s8, 512  ;;  %p1355_p1 = scmp.lt.s32.totalorder %s201_s8, %s201_s8 }
  0x4d   : > { %p1348_p9 = scmp.ne.s32.totalorder %s201_s8, %s1347_s29  ;;  %p1356_p4 = scmp.lt.s32.totalorder %s1347_s29, %s1347_s29 }
  0x4f   : > { %p1350_p12 = pnand %p1348_p9, %p1615_p13  ;;  %p1357_p8 = por %p1356_p4, %p1355_p1 }
  0x51   : > { %p1351_p0 = pneg %p1350_p12 }
  0x53   : > { %p1358_p2 = pnand %p1357_p8, %p1351_p0 }
  0x55   : > { %1361 = shalt.err (!%p1358_p2)
}
  0x56   : > { %s1489_s6 = smov 128   ;;  %s1490_s14 = smov 8  }
  0x57   : > { %1170 = dma.hbm_to_vmem [thread:$0]  (!%p1599_p11), %s1888_s3, 512, %s201_s8, [#allocation10], %s1489_s6, %s1489_s6, %s1490_s14  }
  0x58   : > { %s41_s26 = sadd.s32 1, %s1470_s17  ;;  %s34_s9 = sadd.s32 1, %s1478_s19 }
  0x59   : > { %p48_p2 = scmp.ne.s32.totalorder %s1470_s17, %s1466_s16  ;;  %p36_p8 = scmp.ge.s32.totalorder %s34_s9, 2 }
  0x5a   : > { %p49_p13 = scmp.eq.s32.totalorder %s1482_s20, 0  ;;  %p1903_p6 = scmp.ne.s32.totalorder %s1896_s24, 0 }
  0x5b   : > { %p1182_p3 = scmp.lt.s32.totalorder %s1482_s20, 2  ;;  %s1918_s9 = smov (%p36_p8, %s34_s9), 0 }
  0x5c   : > { %p1685_p10 = por %p1903_p6, %p48_p2  ;;  %p50_p5 = por %p49_p13, %p48_p2 }
  0x5d   : > { %s214_s30 = sand.u32 1, %s1470_s17   ;;  %s38_s11 = ssub.s32 %s1478_s19, %s1918_s9 }
  0x5e   : > { %p39_p7 = scmp.eq.s32.totalorder %s38_s11, 0  ;;  %s1027_s8 = sshll.u32 %s214_s30, 2 }
  0x5f   : > { %s1028_s12 = sshll.u32 %s1478_s19, 6  ;;  %s218_s28 = scalar_lea.vmem [#allocation3], %s1027_s8 }
  0x60   : > { %s1697_s13 = scalar_select %p39_p7, %s1470_s17, %s41_s26  }
  0x61   : > { %s1702_s24 = scalar_lea.hbm %s1885_s0, %s1028_s12  ;;  %s225_s29 = sshll.u32 %s218_s28, 4  ;;  %s1704_s29 = int_to_ptr.vmem [resolvable:$true] %s225_s29 }
  0x62   : > { %p1708_p11 = pnand %p1182_p3, %p50_p5  ;;  %s215_s14 = scalar_lea.sflag [#allocation4], %s214_s30 }
  0x63   : > { %s1362_s5 = scalar_lea.hbm %s1702_s24, 64  ;;  %s1367_s11 = scalar_lea.hbm %s1885_s0, 128 }
  0x64   : > { %p1363_p9 = scmp.ne.s32.totalorder %s1702_s24, %s1362_s5  ;;  %p1364_p12 = pneg %p1708_p11 }
  0x65   : > { %p1368_p4 = scmp.lt.u32.totalorder %s1702_s24, %s1885_s0  ;;  %p1369_p2 = scmp.lt.u32.totalorder %s1367_s11, %s1362_s5 }
  0x66   : > { %p1365_p0 = pnand %p1364_p12, %p1363_p9  ;;  %p1371_p13 = scmp.lt.u32.totalorder %s1362_s5, %s1702_s24 }
  0x67   : > { %p1370_p8 = por %p1369_p2, %p1368_p4 }
  0x68   : > { %p1366_p1 = pneg %p1365_p0 }
  0x69   : > { %p1372_p6 = por %p1371_p13, %p1370_p8 }
  0x6b   : > { %p1373_p3 = pnand %p1372_p6, %p1366_p1 }
  0x6d   : > { %1376 = shalt.err (!%p1373_p3)
}
  0x6e   : > { %s1377_s30 = scalar_lea.vmem %s1704_s29, 64  ;;  %s1491_s21 = smov [#allocation3]  }
  0x6f   : > { %p1378_p5 = scmp.ne.s32.totalorder %s1704_s29, %s1377_s30  ;;  %s1382_s22 = sshll.u32 %s1491_s21, 4  ;;  %s1383_s22 = int_to_ptr.vmem [resolvable:$false] %s1382_s22 }
  0x70   : > { %s1384_s28 = scalar_lea.vmem %s1383_s22, 128  ;;  %p1385_p0 = scmp.lt.s32.totalorder %s1704_s29, %s1383_s22 }
  0x71   : > { %p1380_p7 = pnand %p1378_p5, %p1364_p12  ;;  %p1386_p4 = scmp.lt.s32.totalorder %s1384_s28, %s1377_s30 }
  0x73   : > { %p1381_p9 = pneg %p1380_p7  ;;  %p1387_p2 = por %p1386_p4, %p1385_p0 }
  0x75   : > { %p1388_p8 = pnand %p1387_p2, %p1381_p9 }
  0x77   : > { %1391 = shalt.err (!%p1388_p8)
}
  0x78   : > { %1174 = dma.hbm_to_vmem [thread:$0]  (!%p1708_p11), %s1702_s24, 64, %s1704_s29, %s215_s14  }
  0x79   : > { %p1906_p1 = scmp.ne.s32.totalorder %s1900_s27, 0 }
  0x7a   : > { %s1740_s5 = sand.u32 (!%p1906_p1), 1, %s1466_s16   ;;  %p1907_p12 = scmp.ne.s32.totalorder (!%p1906_p1), %s1897_s25, 0 }
  0x7b   : > { %234 = sbr.rel (%p1906_p1) target bundleno = 1640 (0x668), region = 36  ;;  %s1030_s7 = sshll.u32 (!%p1906_p1), %s1740_s5, 2 }
  0x7c   : > { %s237_s26 = scalar_lea.sflag (!%p1906_p1), [#allocation4], %s1740_s5  ;;  %s240_s11 = scalar_lea.vmem (!%p1906_p1), [#allocation3], %s1030_s7 }
  0x82   : > { %1445 = dma.done.wait (%p1907_p12), %s237_s26, 64  }
  0x83   : > { %1447 = vsyncadd (%p1907_p12), %s237_s26, 4294967232  ;;  %p1908_p13 = scmp.ne.s32.totalorder %s1895_s23, 0 }
  0x85   : > { %1449 = dma.done.wait (%p1908_p13), [#allocation7], 512  }
  0x86   : > { %1451 = vsyncadd (%p1908_p13), [#allocation7], 4294966784 }
  0x87   : > { %1453 = dma.done.wait (%p1908_p13), [#allocation10], 512  }
  0x88   : > { %1455 = vsyncadd (%p1908_p13), [#allocation10], 4294966784  ;;  %v1492_v0 = vmov 0.0   ;;  %vm1493_vm0 = vmmov 0   ;;  %v1258_v1 = vld [vmem:[#allocation6] sm:$0xff]   ;;  %v1259_v2 = vld [vmem:[#allocation6 + $0x8] sm:$0xff]  }
  0x89   : > { %1081 = vmatprep.subr.bf16.mxu0 %v1492_v0  ;;  %1085 = vmatprep.mubr.msk.bf16.mxu0 %vm1493_vm0, %v1492_v0  ;;  %vm283_vm1 = vcmask 261120   ;;  %v285_v3 = vld [vmem:[%s240_s11] sm:$0xf]  ;;  %s1494_s23 = smov 120   ;;  %s1495_s25 = smov 96   ;;  %vm354_vm2 = vcmask 64512  }
  0x8a   : > { %1089 = vmatprep.subr.bf16.mxu1 %v1492_v0  ;;  %1091 = vmatprep.mubr.msk.bf16.mxu1 %vm1493_vm0, %v1492_v0  ;;  %s1496_s27 = smov 80   ;;  %s1497_s24 = smov 88   ;;  %v350_v20 = vld [vmem:[#allocation9] sm:$0xff]  ;;  %v466_v27 = vld [vmem:[#allocation9 + $0x8] sm:$0xff]  ;;  %v587_v34 = vld [vmem:[#allocation9 + $0x10] sm:$0xff]  ;;  %vm418_vm3 = vcmask 1043456  }
  0x8b   : > { %1082 = vmatpush3.bf16.msra.mxu0 %v1258_v1  ;;  %s1498_s29 = smov 72   ;;  %s1499_s6 = smov 112   ;;  %v708_v41 = vld [vmem:[#allocation9 + $0x18] sm:$0xff]  ;;  %vm463_vm4 = vcmask 60416   ;;  %vm584_vm5 = vcmask 126016   ;;  %vm705_vm6 = vcmask 191616  }
  0x8c   : > { %1083 = vmatprep.subr.bf16.mxu0 %v1492_v0  ;;  %s1500_s14 = smov 104   ;;  %s1501_s8 = smov 56   ;;  %vm826_vm7 = vcmask 257216  }
  0x8d   : > { %s1502_s12 = smov 64   ;;  %s1503_s30 = smov 40  }
  0x8e   : > { %s1504_s21 = smov 48   ;;  %s1505_s22 = smov 8  }
  0x8f   : > { %1084 = vmatpush3.bf16.msra.mxu0 %v1259_v2  ;;  %s1506_s28 = smov 16   ;;  %s1034_s7 = sshll.u32 %s1740_s5, 3 }
  0x90   : > { %1095 = vmatprep.subr.bf16.mxu0 %v1492_v0  ;;  %s276_s26 = scalar_lea.vmem [#allocation11], %s1034_s7  ;;  %s1507_s11 = smov 24  }
  0x91   : > { %284 = vst.msk [vmem:[%s276_s26] sm:$0xff] %vm283_vm1, %v1492_v0 }
  0x92   : > { %1086 = vmatmul.mubr.msk.bf16.vlgmr.msra.gmra.mrb[0].mxu0 %vm283_vm1, %v285_v3 }
  0x93   : > { %1097 = vmatprep.mubr.msk.bf16.mxu0 %vm1493_vm0, %v1492_v0 }
 0x165   : > { %v343_v4 = vpop.f32.mrb[0].mxu0 }
 0x166   : > { %v1767_v5 = vpack.c.bf16 %v343_v4, %v343_v4  ;;  %v1087_v6 = vpop.f32.mrb[1].mxu0 }
 0x167   : > { %v346_v7 = vpop.f32.mrb[2].mxu0 }
 0x168   : > { %467 = vrot.lane.b32.xlu1 %v1767_v5, %s1494_s23  ;;  %352 = vrot.lane.b32.xlu0 %v1767_v5, %s1495_s25  ;;  %v1088_v8 = vpop.f32.mrb[3].mxu0  ;;  %s1053_s23 = sshll.u32 %s1474_s18, 7  ;;  %s907_s25 = sshll.u32 %s276_s26, 4  ;;  %s1837_s25 = int_to_ptr.vmem [resolvable:$true] %s907_s25 }
 0x169   : > { %s1392_s18 = scalar_lea.vmem %s1837_s25, 128 }
 0x16a   : > { %p1393_p11 = scmp.ne.s32.totalorder %s1837_s25, %s1392_s18 }
 0x16c   : > { %590 = vrot.lane.b32.xlu1 %v1767_v5, %s1496_s27  ;;  %469 = vrot.lane.b32.xlu0 %v1767_v5, %s1497_s24  ;;  %p1394_p6 = pnand %p1393_p11, %p1685_p10 }
 0x16e   : > { %p1395_p3 = pneg %p1394_p6 }
 0x170   : > { %711 = vrot.lane.b32.xlu1 %v1767_v5, %s1498_s29  ;;  %588 = vrot.lane.b32.xlu0 %v1767_v5, %s1499_s6  ;;  %s1835_s29 = scalar_lea.hbm %s1889_s4, %s1053_s23  ;;  %s894_s6 = scalar_lea.sflag [#allocation5], %s1740_s5 }
 0x174   : > { %709 = vrot.lane.b32.xlu0 %v1767_v5, %s1500_s14  ;;  %s1508_s14 = smov [#allocation11]  }
 0x1da   : > { %v353_v9 = vpop.permute.xlu0 %352  ;;  %v468_v12 = vpop.permute.xlu1 %467 }
 0x1db   : > { %v359_v10 = vsel %vm354_vm2, %v353_v9, 0 }
 0x1dc   : > { %1090 = vmatpush3.bf16.xpose.msra.mxu1 %v359_v10 }
 0x1dd   : > { %1101 = vmatprep.subr.bf16.mxu1 %v1492_v0 }
 0x1de   : > { %v470_v11 = vpop.permute.xlu0 %469  ;;  %v591_v14 = vpop.permute.xlu1 %590 }
 0x1df   : > { %v475_v13 = vsel %vm354_vm2, %v470_v11, 0  ;;  %v596_v15 = vsel %vm354_vm2, %v591_v14, 0 }
 0x1e2   : > { %v712_v16 = vpop.permute.xlu1 %711  ;;  %v589_v17 = vpop.permute.xlu0 %588 }
 0x1e3   : > { %1092 = vmatmul.mubr.msk.bf16.vlgmr.msra.gmra.mrb[0].mxu1 %vm354_vm2, %v1767_v5  ;;  %v717_v18 = vsel %vm354_vm2, %v712_v16, 0 }
 0x1e4   : > { %1102 = vmatpush3.bf16.xpose.msra.mxu1 %v475_v13  ;;  %1103 = vmatprep.mubr.msk.bf16.mxu1 %vm1493_vm0, %v1492_v0 }
 0x1e5   : > { %1113 = vmatprep.subr.bf16.mxu1 %v1492_v0 }
 0x1e6   : > { %v710_v19 = vpop.permute.xlu0 %709 }
 0x1eb   : > { %1104 = vmatmul.mubr.msk.bf16.vlgmr.msra.gmra.mrb[4].mxu1 %vm354_vm2, %v468_v12 }
 0x1ec   : > { %1114 = vmatpush3.bf16.xpose.msra.mxu1 %v596_v15  ;;  %1115 = vmatprep.mubr.msk.bf16.mxu1 %vm1493_vm0, %v1492_v0 }
 0x1ed   : > { %1125 = vmatprep.subr.bf16.mxu1 %v1492_v0 }
 0x1f3   : > { %1116 = vmatmul.mubr.msk.bf16.vlgmr.msra.gmra.mrb[8].mxu1 %vm354_vm2, %v589_v17 }
 0x1f4   : > { %1126 = vmatpush3.bf16.xpose.msra.mxu1 %v717_v18  ;;  %1127 = vmatprep.mubr.msk.bf16.mxu1 %vm1493_vm0, %v1492_v0 }
 0x1f5   : > { %1137 = vmatprep.subr.bf16.mxu1 %v1492_v0 }
 0x1fb   : > { %1128 = vmatmul.mubr.msk.bf16.vlgmr.msra.gmra.mrb[12].mxu1 %vm354_vm2, %v710_v19 }
 0x1fc   : > { %1141 = vmatprep.mubr.msk.bf16.mxu1 %vm1493_vm0, %v1492_v0 }
 0x2b6   : > { %v395_v21 = vpop.f32.mrb[0].mxu1 }
 0x2b7   : > { %v396_v22 = vadd.f32 %v395_v21, %v350_v20  ;;  %v1093_v23 = vpop.f32.mrb[1].mxu1 }
 0x2b8   : > { %v398_v24 = vpop.f32.mrb[2].mxu1 }
 0x2b9   : > { %v1094_v25 = vpop.f32.mrb[3].mxu1  ;;  %v401_v26 = vsel %vm354_vm2, %v396_v22, -inf }
 0x2ba   : > { %402 = vmax.xlane.f32.xlu1 %v401_v26 }
 0x2be   : > { %v511_v28 = vpop.f32.mrb[4].mxu1 }
 0x2bf   : > { %v512_v29 = vadd.f32 %v511_v28, %v466_v27  ;;  %v1105_v30 = vpop.f32.mrb[5].mxu1 }
 0x2c0   : > { %v514_v31 = vpop.f32.mrb[6].mxu1 }
 0x2c1   : > { %v1106_v32 = vpop.f32.mrb[7].mxu1  ;;  %v517_v33 = vsel %vm354_vm2, %v512_v29, -inf }
 0x2c2   : > { %518 = vmax.xlane.f32.xlu0 %v517_v33 }
 0x2c6   : > { %v632_v35 = vpop.f32.mrb[8].mxu1 }
 0x2c7   : > { %v633_v36 = vadd.f32 %v632_v35, %v587_v34  ;;  %v1117_v37 = vpop.f32.mrb[9].mxu1 }
 0x2c8   : > { %v635_v38 = vpop.f32.mrb[10].mxu1 }
 0x2c9   : > { %v1118_v39 = vpop.f32.mrb[11].mxu1  ;;  %v638_v40 = vsel %vm354_vm2, %v633_v36, -inf }
 0x2ca   : > { %639 = vmax.xlane.f32.xlu0 %v638_v40  ;;  %v1260_v39 = vld [vmem:[#allocation8] sm:$0xff]   ;;  %v1261_v40 = vld [vmem:[#allocation8 + $0x8] sm:$0xff]  }
 0x2cb   : > { %1138 = vmatpush3.bf16.msra.mxu1 %v1260_v39 }
 0x2cc   : > { %1139 = vmatprep.subr.bf16.mxu1 %v1492_v0 }
 0x2ce   : > { %v753_v42 = vpop.f32.mrb[12].mxu1 }
 0x2cf   : > { %v754_v43 = vadd.f32 %v753_v42, %v708_v41  ;;  %v1129_v44 = vpop.f32.mrb[13].mxu1  ;;  %1140 = vmatpush3.bf16.msra.mxu1 %v1261_v40 }
 0x2d0   : > { %v756_v45 = vpop.f32.mrb[14].mxu1 }
 0x2d1   : > { %v1130_v46 = vpop.f32.mrb[15].mxu1  ;;  %v759_v47 = vsel %vm354_vm2, %v754_v43, -inf }
 0x2d2   : > { %760 = vmax.xlane.f32.xlu1 %v759_v47 }
 0x347   : > { %v403_v48 = vpop.xlane.xlu1 %402 }
 0x348   : > { %v404_v49 = vsub.f32 %v396_v22, %v403_v48 }
 0x34a   : > { %v405_v50 = vmul.f32 1.442695, %v404_v49 }
 0x34c   : > { %1262 = vpow2.f32 %v405_v50 }
 0x34f   : > { %v519_v51 = vpop.xlane.xlu0 %518 }
 0x350   : > { %v520_v52 = vsub.f32 %v512_v29, %v519_v51 }
 0x352   : > { %v521_v53 = vmul.f32 1.442695, %v520_v52 }
 0x354   : > { %1264 = vpow2.f32 %v521_v53 }
 0x356   : > { %v1263_v54 = vpop.eup %1262 }
 0x357   : > { %v640_v55 = vpop.xlane.xlu0 %639  ;;  %v407_v56 = vsel %vm354_vm2, %v1263_v54, 0.0 }
 0x358   : > { %v641_v57 = vsub.f32 %v633_v36, %v640_v55  ;;  %408 = vadd.xlane.f32.xlu0 %v407_v56 }
 0x35a   : > { %v642_v58 = vmul.f32 1.442695, %v641_v57 }
 0x35c   : > { %1266 = vpow2.f32 %v642_v58 }
 0x35e   : > { %v1265_v59 = vpop.eup %1264 }
 0x35f   : > { %v523_v60 = vsel %vm354_vm2, %v1265_v59, 0.0  ;;  %v761_v63 = vpop.xlane.xlu1 %760 }
 0x360   : > { %524 = vadd.xlane.f32.xlu1 %v523_v60  ;;  %v762_v1 = vsub.f32 %v754_v43, %v761_v63 }
 0x362   : > { %v763_v2 = vmul.f32 1.442695, %v762_v1 }
 0x364   : > { %1268 = vpow2.f32 %v763_v2 }
 0x366   : > { %v1267_v61 = vpop.eup %1266 }
 0x367   : > { %v644_v62 = vsel %vm354_vm2, %v1267_v61, 0.0 }
 0x368   : > { %645 = vadd.xlane.f32.xlu0 %v644_v62 }
 0x36e   : > { %v1269_v3 = vpop.eup %1268 }
 0x36f   : > { %v765_v4 = vsel %vm354_vm2, %v1269_v3, 0.0 }
 0x371   : > { %529 = vrot.lane.b32.xlu1 %v1767_v5, %s1501_s8  ;;  %s1396_s8 = sshll.u32 %s1508_s14, 4  ;;  %s1397_s8 = int_to_ptr.vmem [resolvable:$false] %s1396_s8 }
 0x372   : > { %p1399_p5 = scmp.lt.s32.totalorder %s1837_s25, %s1397_s8 }
 0x37e   : > { %413 = vrot.lane.b32.xlu0 %v1767_v5, %s1502_s12  ;;  %s1398_s12 = scalar_lea.vmem %s1397_s8, 256 }
 0x37f   : > { %p1400_p7 = scmp.lt.s32.totalorder %s1398_s12, %s1392_s18 }
 0x381   : > { %p1401_p9 = por %p1400_p7, %p1399_p5 }
 0x382   : > { %771 = vrot.lane.b32.xlu0 %v1767_v5, %s1503_s30 }
 0x383   : > { %p1402_p0 = pnand %p1401_p9, %p1395_p3 }
 0x395   : > { %766 = vadd.xlane.f32.xlu1 %v765_v4 }
 0x3a6   : > { %650 = vrot.lane.b32.xlu1 %v1767_v5, %s1504_s21 }
 0x3e5   : > { %v409_v6 = vpop.xlane.xlu0 %408 }
 0x3e6   : > { %1270 = vrcp.f32 %v409_v6 }
 0x3ed   : > { %v525_v7 = vpop.xlane.xlu1 %524 }
 0x3ee   : > { %1272 = vrcp.f32 %v525_v7 }
 0x3f0   : > { %v1271_v8 = vpop.eup %1270 }
 0x3f1   : > { %v411_v10 = vmul.f32 %v1271_v8, %v1263_v54  ;;  %v530_v13 = vpop.permute.xlu1 %529 }
 0x3f2   : > { %v535_v16 = vsel %vm418_vm3, %v530_v13, 0 }
 0x3f3   : > { %v412_v14 = vpack.c.bf16 %v411_v10, %v411_v10 }
 0x3f5   : > { %v646_v9 = vpop.xlane.xlu0 %645 }
 0x3f6   : > { %1274 = vrcp.f32 %v646_v9 }
 0x3f8   : > { %v1273_v15 = vpop.eup %1272 }
 0x3f9   : > { %v414_v11 = vpop.permute.xlu0 %413  ;;  %v527_v5 = vmul.f32 %v1273_v15, %v1265_v59 }
 0x3fa   : > { %v420_v12 = vsel %vm418_vm3, %v414_v11, 0 }
 0x3fb   : > { %1096 = vmatpush3.bf16.msra.mxu0 %v420_v12  ;;  %v528_v17 = vpack.c.bf16 %v527_v5, %v527_v5 }
 0x3fc   : > { %1107 = vmatprep.subr.bf16.mxu0 %v1492_v0 }
 0x3fd   : > { %v772_v23 = vpop.permute.xlu0 %771 }
 0x3fe   : > { %1098 = vmatmul.mubr.msk.bf16.vlgmr.msra.gmra.mrb[4].mxu0 %vm354_vm2, %v412_v14  ;;  %v777_v25 = vsel %vm418_vm3, %v772_v23, 0 }
 0x3ff   : > { %1108 = vmatpush3.bf16.msra.mxu0 %v535_v16  ;;  %1109 = vmatprep.mubr.msk.bf16.mxu0 %vm1493_vm0, %v1492_v0 }
 0x400   : > { %1119 = vmatprep.subr.bf16.mxu0 %v1492_v0  ;;  %v1275_v18 = vpop.eup %1274 }
 0x401   : > { %v648_v20 = vmul.f32 %v1275_v18, %v1267_v61 }
 0x403   : > { %v649_v24 = vpack.c.bf16 %v648_v20, %v648_v20 }
 0x406   : > { %1110 = vmatmul.mubr.msk.bf16.vlgmr.msra.gmra.mrb[8].mxu0 %vm354_vm2, %v528_v17 }
 0x407   : > { %1121 = vmatprep.mubr.msk.bf16.mxu0 %vm1493_vm0, %v1492_v0 }
 0x422   : > { %v767_v19 = vpop.xlane.xlu1 %766 }
 0x423   : > { %1276 = vrcp.f32 %v767_v19 }
 0x426   : > { %v651_v21 = vpop.permute.xlu1 %650 }
 0x427   : > { %v656_v22 = vsel %vm418_vm3, %v651_v21, 0 }
 0x428   : > { %1120 = vmatpush3.bf16.msra.mxu0 %v656_v22 }
 0x429   : > { %1131 = vmatprep.subr.bf16.mxu0 %v1492_v0 }
 0x42b   : > { %1122 = vmatmul.mubr.msk.bf16.vlgmr.msra.gmra.mrb[12].mxu0 %vm354_vm2, %v649_v24 }
 0x42c   : > { %1132 = vmatpush3.bf16.msra.mxu0 %v777_v25  ;;  %1133 = vmatprep.mubr.msk.bf16.mxu0 %vm1493_vm0, %v1492_v0  ;;  %v828_v0 = vld [vmem:[%s276_s26] sm:$0xff] }
 0x42d   : > { %v1277_v26 = vpop.eup %1276 }
 0x42e   : > { %v769_v27 = vmul.f32 %v1277_v26, %v1269_v3 }
 0x430   : > { %v770_v28 = vpack.c.bf16 %v769_v27, %v769_v27 }
 0x433   : > { %1134 = vmatmul.mubr.msk.bf16.vlgmr.msra.gmra.mrb[16].mxu0 %vm354_vm2, %v770_v28 }
 0x4d1   : > { %v456_v29 = vpop.f32.mrb[4].mxu0 }
 0x4d2   : > { %v462_v30 = vpack.c.bf16 %v456_v29, %v456_v29  ;;  %v1099_v31 = vpop.f32.mrb[5].mxu0 }
 0x4d3   : > { %v459_v32 = vpop.f32.mrb[6].mxu0 }
 0x4d4   : > { %464 = vst.msk [vmem:[#allocation2] sm:$0xf] %vm463_vm4, %v462_v30  ;;  %v1100_v33 = vpop.f32.mrb[7].mxu0 }
 0x4d9   : > { %v571_v34 = vpop.f32.mrb[8].mxu0 }
 0x4da   : > { %v1056_v35 = vpack.c.bf16 %v571_v34, %v571_v34  ;;  %v1111_v36 = vpop.f32.mrb[9].mxu0 }
 0x4db   : > { %v574_v37 = vpop.f32.mrb[10].mxu0 }
 0x4dc   : > { %581 = vrot.lane.b32.xlu1 %v1056_v35, %s1505_s22  ;;  %v1112_v38 = vpop.f32.mrb[11].mxu0 }
 0x4fe   : > { %v692_v41 = vpop.f32.mrb[12].mxu0 }
 0x4ff   : > { %v1057_v42 = vpack.c.bf16 %v692_v41, %v692_v41  ;;  %v1123_v43 = vpop.f32.mrb[13].mxu0 }
 0x500   : > { %v695_v44 = vpop.f32.mrb[14].mxu0 }
 0x501   : > { %702 = vrot.lane.b32.xlu0 %v1057_v42, %s1506_s28  ;;  %v1124_v45 = vpop.f32.mrb[15].mxu0 }
 0x506   : > { %v813_v46 = vpop.f32.mrb[16].mxu0 }
 0x507   : > { %v1058_v47 = vpack.c.bf16 %v813_v46, %v813_v46  ;;  %v1135_v48 = vpop.f32.mrb[17].mxu0 }
 0x508   : > { %v816_v49 = vpop.f32.mrb[18].mxu0 }
 0x509   : > { %823 = vrot.lane.b32.xlu1 %v1058_v47, %s1507_s11  ;;  %v1136_v50 = vpop.f32.mrb[19].mxu0 }
 0x54e   : > { %v582_v51 = vpop.permute.xlu1 %581 }
 0x54f   : > { %585 = vst.msk [vmem:[#allocation2] sm:$0xf] %vm584_vm5, %v582_v51 }
 0x573   : > { %v703_v52 = vpop.permute.xlu0 %702 }
 0x574   : > { %706 = vst.msk [vmem:[#allocation2] sm:$0xf] %vm705_vm6, %v703_v52 }
 0x57b   : > { %v824_v53 = vpop.permute.xlu1 %823 }
 0x57c   : > { %827 = vst.msk [vmem:[#allocation2] sm:$0xf] %vm826_vm7, %v824_v53 }
 0x583   : > { %v829_v54 = vld [vmem:[#allocation2] sm:$0xf] }
 0x584   : > { %1142 = vmatmul.mubr.msk.bf16.vlgmr.msra.gmra.mrb[16].mxu1 %vm283_vm1, %v829_v54 }
 0x657   : > { %v885_v55 = vpop.f32.mrb[16].mxu1 }
 0x658   : > { %v891_v56 = vadd.f32 %v885_v55, %v828_v0  ;;  %v1143_v57 = vpop.f32.mrb[17].mxu1 }
 0x659   : > { %v888_v58 = vpop.f32.mrb[18].mxu1 }
 0x65a   : > { %892 = vst.msk [vmem:[%s276_s26] sm:$0xff] %vm283_vm1, %v891_v56  ;;  %v1144_v59 = vpop.f32.mrb[19].mxu1 }
 0x65b   : > { %1405 = shalt.err (!%p1402_p0)
}
 0x65c   : > { %s1406_s5 = scalar_lea.hbm %s1835_s29, 128  ;;  %s1410_s22 = scalar_lea.hbm %s1889_s4, 256 }
 0x65d   : > { %p1407_p4 = scmp.ne.s32.totalorder %s1835_s29, %s1406_s5  ;;  %p1411_p1 = scmp.lt.u32.totalorder %s1835_s29, %s1889_s4 }
 0x65e   : > { %p1412_p12 = scmp.lt.u32.totalorder %s1410_s22, %s1406_s5  ;;  %p1414_p11 = scmp.lt.u32.totalorder %s1406_s5, %s1835_s29 }
 0x65f   : > { %p1408_p2 = pnand %p1407_p4, %p1685_p10 }
 0x660   : > { %p1413_p13 = por %p1412_p12, %p1411_p1 }
 0x661   : > { %p1409_p8 = pneg %p1408_p2 }
 0x662   : > { %p1415_p6 = por %p1414_p11, %p1413_p13 }
 0x664   : > { %p1416_p3 = pnand %p1415_p6, %p1409_p8 }
 0x666   : > { %1419 = shalt.err (!%p1416_p3)
}
 0x667   : > { %1159 = dma.vmem_to_hbm [thread:$0]  (%p1685_p10), %s1837_s25, 128, %s1835_s29, %s894_s6  }
 0x668 PF: > { %s1909_s26 = sld [smem:[#allocation16_spill]]  ;;  %s919_s11 = sand.u32 1, %s1462_s15  }
 0x669   : > { %p1911_p7 = scmp.ge.s32.totalorder %s1482_s20, 2  ;;  %s920_s23 = scalar_lea.sflag [#allocation5], %s919_s11 }
 0x66e   : > { %p1910_p5 = scmp.ne.s32.totalorder %s1909_s26, 0 }
 0x670   : > { %p1176_p9 = pnand %p1911_p7, %p1910_p5 }
 0x672   : > { %1457 = dma.done.wait (!%p1176_p9), %s920_s23, 128  }
 0x673   : > { %1459 = vsyncadd (!%p1176_p9), %s920_s23, 4294967168  ;;  %s22_s20 = sadd.s32 1, %s1482_s20   ;;  %s1912_s15 = smov %s1466_s16 }
 0x674   : > { %p19_p0 = scmp.ge.s32.totalorder %s22_s20, 4   ;;  %s1913_s16 = smov %s1470_s17 }
 0x675   : > { %s1914_s17 = smov %s1697_s13  ;;  %s1915_s18 = smov %s1478_s19 }
 0x676   : > { %s1916_s19 = smov %s1918_s9  ;;  %21 = sbr.rel (!%p19_p0) target bundleno = 8 (0x8), region = 103 }
 0x67d   :  { %925 = vsyncpa [#allocation4], 1 }
 0x67e   :  { %927 = vsyncpa [#allocation4 + $0x1], 1 }
 0x67f   :  { %928 = vsyncpa [#allocation7], 1 }
 0x680   :  { %929 = vsyncpa [#allocation10], 1 }
 0x681   :  { %930 = vsyncpa [#allocation5], 1 }
 0x682   :  { %932 = vsyncpa [#allocation5 + $0x1], 1 }

</bundles_post_ra>
